<compile_context>
chip_gen: v7x
topology: tpu7x:2x2x1
jax: 0.10.0
libtpu: 0.0.40
codegen_flags: <defaults>
</compile_context>

<pallas_src>
import jax
import jax.numpy as jnp
from jax.experimental import pallas as pl
from jax.experimental.pallas import tpu as pltpu


def _round_up(x: int, m: int) -> int:
    return ((x + m - 1) // m) * m


def _mlp_backbone(obs, w1_ref, b1_ref, w2_ref, b2_ref):
    """Two-layer ReLU MLP on the MXU with f32 accumulation."""
    h1 = jnp.dot(obs, w1_ref[...], preferred_element_type=jnp.float32) + b1_ref[...]
    h1 = jnp.maximum(h1, 0.0)
    h2 = jnp.dot(h1, w2_ref[...], preferred_element_type=jnp.float32) + b2_ref[...]
    return jnp.maximum(h2, 0.0)


def _actor_det_kernel(obs_ref, w1_ref, b1_ref, w2_ref, b2_ref,
                      wmu_ref, bmu_ref, mu_ref):
    """Deterministic path: action == mu. No eps stream, single [TB, A] store."""
    h2 = _mlp_backbone(obs_ref[...], w1_ref, b1_ref, w2_ref, b2_ref)
    mu_ref[...] = (jnp.dot(h2, wmu_ref[...], preferred_element_type=jnp.float32)
                   + bmu_ref[...])


def _actor_sample_kernel(obs_ref, w1_ref, b1_ref, w2_ref, b2_ref,
                         wh_ref, bh_ref, sig_ref, eps_ref, out_ref):
    """Stochastic path.

    wh = [wmu | wmu], bh = [bmu | bmu]  ->  head  = [mu | mu]   (one MXU matmul)
    sig = [sigma | 0], eps_p = [eps | 0] ->  out  = [mu + sigma*eps | mu]
    Single packed [TB, 2A] output slab = one writeback stream.
    """
    h2 = _mlp_backbone(obs_ref[...], w1_ref, b1_ref, w2_ref, b2_ref)
    head = jnp.dot(h2, wh_ref[...], preferred_element_type=jnp.float32) + bh_ref[...]
    out_ref[...] = head + sig_ref[...] * eps_ref[...]


def actor_prob_forward(obs, params, eps=None, *, deterministic: bool):
    """Returns (action, mu, sigma), matching the fused ActorProb forward."""
    B, obs_dim = obs.shape
    hid = params["w1"].shape[1]
    A = params["wmu"].shape[1]

    # Batch tile: multiple of 8 sublanes, capped at 256 rows to amortize per-step
    # overhead while staying tiny vs VMEM on all chips (v7x's 64 MiB included).
    TB = min(256, _round_up(B, 8))
    B_pad = _round_up(B, TB)
    n_tiles = B_pad // TB

    obs_p = obs if B_pad == B else jnp.pad(obs, ((0, B_pad - B), (0, 0)))

    # sigma is state-independent -> hoisted out of the kernel entirely.
    sigma_row = jnp.exp(jnp.clip(params["log_std"], -20.0, 2.0))        # [1, A]
    sigma = jnp.broadcast_to(sigma_row, (B, A))

    const = lambda shape: pl.BlockSpec(shape, lambda i, _s=shape: (0,) * len(_s))
    batched = lambda feat: pl.BlockSpec((TB, feat), lambda i: (i, 0))
    cparams = pltpu.CompilerParams(dimension_semantics=("parallel",))

    if deterministic:
        mu_p = pl.pallas_call(
            _actor_det_kernel,
            out_shape=jax.ShapeDtypeStruct((B_pad, A), jnp.float32),
            grid=(n_tiles,),
            in_specs=[
                batched(obs_dim),
                const((obs_dim, hid)), const((1, hid)),
                const((hid, hid)), const((1, hid)),
                const((hid, A)), const((1, A)),
            ],
            out_specs=batched(A),
            compiler_params=cparams,
        )(obs_p, params["w1"], params["b1"], params["w2"], params["b2"],
          params["wmu"], params["bmu"])
        mu = mu_p[:B]
        return mu, mu, sigma

    # --- stochastic (reparameterized) path ---
    assert eps is not None, "eps required when deterministic=False"
    w_head = jnp.concatenate([params["wmu"], params["wmu"]], axis=1)    # [hid, 2A]
    b_head = jnp.concatenate([params["bmu"], params["bmu"]], axis=1)    # [1, 2A]
    sig_p = jnp.concatenate([sigma_row, jnp.zeros_like(sigma_row)], axis=1)  # [1, 2A]
    eps_p = jnp.pad(eps, ((0, B_pad - B), (0, A)))                      # [B_pad, 2A]

    out_p = pl.pallas_call(
        _actor_sample_kernel,
        out_shape=jax.ShapeDtypeStruct((B_pad, 2 * A), jnp.float32),
        grid=(n_tiles,),
        in_specs=[
            batched(obs_dim),
            const((obs_dim, hid)), const((1, hid)),
            const((hid, hid)), const((1, hid)),
            const((hid, 2 * A)), const((1, 2 * A)),
            const((1, 2 * A)),
            batched(2 * A),
        ],
        out_specs=batched(2 * A),
        compiler_params=cparams,
    )(obs_p, params["w1"], params["b1"], params["w2"], params["b2"],
      w_head, b_head, sig_p, eps_p)

    act = out_p[:B, :A]
    mu = out_p[:B, A:]
    return act, mu, sigma


def init_params(key, obs_dim, hidden, action_dim):
    ks = jax.random.split(key, 3)
    scale = lambda fan_in: 1.0 / jnp.sqrt(fan_in)
    return {
        "w1": jax.random.normal(ks[0], (obs_dim, hidden), jnp.float32) * scale(obs_dim),
        "b1": jnp.zeros((1, hidden), jnp.float32),
        "w2": jax.random.normal(ks[1], (hidden, hidden), jnp.float32) * scale(hidden),
        "b2": jnp.zeros((1, hidden), jnp.float32),
        "wmu": jax.random.normal(ks[2], (hidden, action_dim), jnp.float32) * scale(hidden),
        "bmu": jnp.zeros((1, action_dim), jnp.float32),
        "log_std": jnp.full((1, action_dim), -0.5, jnp.float32),
    }


def _reference(obs, params, eps, deterministic):
    h1 = jnp.maximum(obs @ params["w1"] + params["b1"], 0.0)
    h2 = jnp.maximum(h1 @ params["w2"] + params["b2"], 0.0)
    mu = h2 @ params["wmu"] + params["bmu"]
    sigma = jnp.broadcast_to(jnp.exp(jnp.clip(params["log_std"], -20.0, 2.0)), mu.shape)
    act = mu if deterministic else mu + sigma * eps
    return act, mu, sigma


if __name__ == "__main__":
    key = jax.random.PRNGKey(0)
    k_param, k_obs, k_eps = jax.random.split(key, 3)

    # Small, module-consistent demo shapes.
    B, OBS, HID, ACT = 16, 16, 32, 8
    params = init_params(k_param, OBS, HID, ACT)
    obs = jax.random.normal(k_obs, (B, OBS), jnp.float32)
    eps = jax.random.normal(k_eps, (B, ACT), jnp.float32)

    # deterministic=True path (forward returns mean action; no eps DMA)
    act_d, mu_d, sig_d = actor_prob_forward(obs, params, deterministic=True)
    # stochastic path (reparameterized sample with fixed eps)
    act_s, mu_s, sig_s = actor_prob_forward(obs, params, eps, deterministic=False)
    jax.block_until_ready((act_d, mu_d, sig_d, act_s, mu_s, sig_s))

    ref_d = _reference(obs, params, eps, True)
    ref_s = _reference(obs, params, eps, False)
    for got, want in zip((act_d, mu_d, sig_d, act_s, mu_s, sig_s), ref_d + ref_s):
        assert got.shape == want.shape, "shape mismatch vs reference"
        assert jnp.allclose(got, want, atol=1e-4, rtol=1e-5), "mismatch vs reference"

    print("KERNEL_OK")
</pallas_src>

<mosaic_0001>
module attributes {stable_mosaic.version = 11 : i64} {
  func.func @_actor_det_kernel(%arg0: i32, %arg1: memref<16x16xf32, #tpu.memory_space<vmem>>, %arg2: memref<16x32xf32, #tpu.memory_space<vmem>>, %arg3: memref<1x32xf32, #tpu.memory_space<vmem>>, %arg4: memref<32x32xf32, #tpu.memory_space<vmem>>, %arg5: memref<1x32xf32, #tpu.memory_space<vmem>>, %arg6: memref<32x8xf32, #tpu.memory_space<vmem>>, %arg7: memref<1x8xf32, #tpu.memory_space<vmem>>, %arg8: memref<16x8xf32, #tpu.memory_space<vmem>>) attributes {dimension_semantics = [#tpu.dimension_semantics<parallel>], iteration_bounds = array<i64: 1>, scalar_prefetch = 0 : i64, scratch_operands = 0 : i64, tpu.core_type = #tpu.core_type<tc>, window_params = [{transform_indices = @transform_0, window_bounds = array<i64: 16, 16>}, {pipeline_mode = #tpu.pipeline_mode<synchronous>, transform_indices = @transform_1, window_bounds = array<i64: 16, 32>}, {pipeline_mode = #tpu.pipeline_mode<synchronous>, transform_indices = @transform_2, window_bounds = array<i64: 1, 32>}, {pipeline_mode = #tpu.pipeline_mode<synchronous>, transform_indices = @transform_3, window_bounds = array<i64: 32, 32>}, {pipeline_mode = #tpu.pipeline_mode<synchronous>, transform_indices = @transform_4, window_bounds = array<i64: 1, 32>}, {pipeline_mode = #tpu.pipeline_mode<synchronous>, transform_indices = @transform_5, window_bounds = array<i64: 32, 8>}, {pipeline_mode = #tpu.pipeline_mode<synchronous>, transform_indices = @transform_6, window_bounds = array<i64: 1, 8>}, {transform_indices = @transform_7, window_bounds = array<i64: 16, 8>}]} {
    %c0 = arith.constant 0 : index
    %c0_0 = arith.constant 0 : index
    %0 = vector.load %arg1[%c0, %c0_0] : memref<16x16xf32, #tpu.memory_space<vmem>>, vector<16x16xf32>
    %c0_1 = arith.constant 0 : index
    %c0_2 = arith.constant 0 : index
    %1 = vector.load %arg2[%c0_1, %c0_2] : memref<16x32xf32, #tpu.memory_space<vmem>>, vector<16x32xf32>
    %cst = arith.constant dense<0.000000e+00> : vector<16x32xf32>
    %2 = tpu.matmul %0, %1, %cst {dimension_numbers = #tpu.dot_dimension_numbers<[1], [0], [0], [1], [0, 0, 1, 1], [], []>} : vector<16x16xf32>, vector<16x32xf32>, vector<16x32xf32> -> vector<16x32xf32>
    %c0_3 = arith.constant 0 : index
    %c0_4 = arith.constant 0 : index
    %3 = vector.load %arg3[%c0_3, %c0_4] : memref<1x32xf32, #tpu.memory_space<vmem>>, vector<1x32xf32>
    %4 = vector.broadcast %3 : vector<1x32xf32> to vector<16x32xf32>
    %5 = arith.addf %2, %4 : vector<16x32xf32>
    %cst_5 = arith.constant 0.000000e+00 : f32
    %6 = vector.broadcast %cst_5 : f32 to vector<16x32xf32>
    %7 = arith.maximumf %5, %6 : vector<16x32xf32>
    %c0_6 = arith.constant 0 : index
    %c0_7 = arith.constant 0 : index
    %8 = vector.load %arg4[%c0_6, %c0_7] : memref<32x32xf32, #tpu.memory_space<vmem>>, vector<32x32xf32>
    %cst_8 = arith.constant dense<0.000000e+00> : vector<16x32xf32>
    %9 = tpu.matmul %7, %8, %cst_8 {dimension_numbers = #tpu.dot_dimension_numbers<[1], [0], [0], [1], [0, 0, 1, 1], [], []>} : vector<16x32xf32>, vector<32x32xf32>, vector<16x32xf32> -> vector<16x32xf32>
    %c0_9 = arith.constant 0 : index
    %c0_10 = arith.constant 0 : index
    %10 = vector.load %arg5[%c0_9, %c0_10] : memref<1x32xf32, #tpu.memory_space<vmem>>, vector<1x32xf32>
    %11 = vector.broadcast %10 : vector<1x32xf32> to vector<16x32xf32>
    %12 = arith.addf %9, %11 : vector<16x32xf32>
    %cst_11 = arith.constant 0.000000e+00 : f32
    %13 = vector.broadcast %cst_11 : f32 to vector<16x32xf32>
    %14 = arith.maximumf %12, %13 : vector<16x32xf32>
    %c0_12 = arith.constant 0 : index
    %c0_13 = arith.constant 0 : index
    %15 = vector.load %arg6[%c0_12, %c0_13] : memref<32x8xf32, #tpu.memory_space<vmem>>, vector<32x8xf32>
    %cst_14 = arith.constant dense<0.000000e+00> : vector<16x8xf32>
    %16 = tpu.matmul %14, %15, %cst_14 {dimension_numbers = #tpu.dot_dimension_numbers<[1], [0], [0], [1], [0, 0, 1, 1], [], []>} : vector<16x32xf32>, vector<32x8xf32>, vector<16x8xf32> -> vector<16x8xf32>
    %c0_15 = arith.constant 0 : index
    %c0_16 = arith.constant 0 : index
    %17 = vector.load %arg7[%c0_15, %c0_16] : memref<1x8xf32, #tpu.memory_space<vmem>>, vector<1x8xf32>
    %18 = vector.broadcast %17 : vector<1x8xf32> to vector<16x8xf32>
    %19 = arith.addf %16, %18 : vector<16x8xf32>
    %c0_17 = arith.constant 0 : index
    %c0_18 = arith.constant 0 : index
    %20 = vector.load %arg8[%c0_17, %c0_18] : memref<16x8xf32, #tpu.memory_space<vmem>>, vector<16x8xf32>
    tpu.vector_store %arg8[%c0_17, %c0_18], %19 {strides = array<i32>} : memref<16x8xf32, #tpu.memory_space<vmem>>, vector<16x8xf32>,
    return
  }
  func.func @transform_0(%arg0: i32) -> (i32, i32) {
    %c0_i32 = arith.constant 0 : i32
    %c0_i32_0 = arith.constant 0 : i32
    return %arg0, %c0_i32 : i32, i32
  }
  func.func @transform_1(%arg0: i32) -> (i32, i32) {
    %c0_i32 = arith.constant 0 : i32
    %c0_i32_0 = arith.constant 0 : i32
    %c0_i32_1 = arith.constant 0 : i32
    return %c0_i32, %c0_i32_0 : i32, i32
  }
  func.func @transform_2(%arg0: i32) -> (i32, i32) {
    %c0_i32 = arith.constant 0 : i32
    %c0_i32_0 = arith.constant 0 : i32
    %c0_i32_1 = arith.constant 0 : i32
    return %c0_i32, %c0_i32_0 : i32, i32
  }
  func.func @transform_3(%arg0: i32) -> (i32, i32) {
    %c0_i32 = arith.constant 0 : i32
    %c0_i32_0 = arith.constant 0 : i32
    %c0_i32_1 = arith.constant 0 : i32
    return %c0_i32, %c0_i32_0 : i32, i32
  }
  func.func @transform_4(%arg0: i32) -> (i32, i32) {
    %c0_i32 = arith.constant 0 : i32
    %c0_i32_0 = arith.constant 0 : i32
    %c0_i32_1 = arith.constant 0 : i32
    return %c0_i32, %c0_i32_0 : i32, i32
  }
  func.func @transform_5(%arg0: i32) -> (i32, i32) {
    %c0_i32 = arith.constant 0 : i32
    %c0_i32_0 = arith.constant 0 : i32
    %c0_i32_1 = arith.constant 0 : i32
    return %c0_i32, %c0_i32_0 : i32, i32
  }
  func.func @transform_6(%arg0: i32) -> (i32, i32) {
    %c0_i32 = arith.constant 0 : i32
    %c0_i32_0 = arith.constant 0 : i32
    %c0_i32_1 = arith.constant 0 : i32
    return %c0_i32, %c0_i32_0 : i32, i32
  }
  func.func @transform_7(%arg0: i32) -> (i32, i32) {
    %c0_i32 = arith.constant 0 : i32
    %c0_i32_0 = arith.constant 0 : i32
    return %arg0, %c0_i32 : i32, i32
  }
}

</mosaic_0001>

<bundles_post_ra>
// kernel: tpu_custom_call.1
= control target key start
LH: loop header
LB: loop body
LE: loop exit
PB: predicated region body
PF: predicated region fallthrough
CT: control target
= control target key end

     0   :  { %12 = vsyncpa [#allocation3], 0  ;;  %s431_s24 = smov [#allocation2]   ;;  %s535_s0 = inlined_call_operand.vmem [shape: f32[16,16], index: 0, kind: input, shape index: {}]   ;;  %s536_s1 = inlined_call_operand.hbm [shape: f32[16,32], index: 1, kind: input, shape index: {}]   ;;  %s537_s2 = inlined_call_operand.vmem [shape: f32[1,32], index: 2, kind: input, shape index: {}]   ;;  %s538_s3 = inlined_call_operand.vmem [shape: f32[32,32], index: 3, kind: input, shape index: {}]   ;;  %s539_s4 = inlined_call_operand.vmem [shape: f32[1,32], index: 4, kind: input, shape index: {}]   ;;  %s540_s5 = inlined_call_operand.vmem [shape: f32[32,8], index: 5, kind: input, shape index: {}]   ;;  %s541_s6 = inlined_call_operand.vmem [shape: f32[1,8], index: 6, kind: input, shape index: {}]   ;;  %s542_s7 = inlined_call_operand.vmem [shape: f32[16,8], index: 7, kind: output, shape index: {}]  }
   0x1   :  { %s20_s25 = sshll.u32 %s431_s24, 4  ;;  %s407_s28 = scalar_lea.hbm %s536_s1, 256  ;;  %s21_s25 = int_to_ptr.vmem [resolvable:$true] %s20_s25 }
   0x2   :  { %p408_p0 = scmp.ne.s32.totalorder %s536_s1, %s407_s28  ;;  %p411_p1 = scmp.lt.u32.totalorder %s407_s28, %s536_s1 }
   0x4   :  { %p413_p2 = pnand %p411_p1, %p408_p0 }
   0x6   :  { %416 = shalt.err (!%p413_p2)
}
   0x7   :  { %s417_s10 = scalar_lea.vmem %s21_s25, 256  ;;  %p422_p4 = scmp.lt.s32.totalorder %s21_s25, %s21_s25 }
   0x8   :  { %p418_p3 = scmp.ne.s32.totalorder %s21_s25, %s417_s10  ;;  %p423_p5 = scmp.lt.s32.totalorder %s417_s10, %s417_s10 }
   0xa   :  { %p424_p6 = por %p423_p5, %p422_p4 }
   0xc   :  { %p425_p7 = pnand %p424_p6, %p418_p3 }
   0xe   :  { %428 = shalt.err (!%p425_p7)
}
   0xf   :  { %s432_s11 = smov 128   ;;  %s433_s12 = smov 8  }
  0x10   :  { %26 = dma.hbm_to_vmem [thread:$0]  %s536_s1, 256, %s21_s25, [#allocation3], %s432_s11, %s432_s11, %s433_s12  }
  0x11   :  { %429 = dma.done.wait [#allocation3], 256  }
  0x12   :  { %430 = vsyncadd [#allocation3], 4294967040  ;;  %vm51_vm0 = vcmask 130048   ;;  %v42_v0 = vld [vmem:[#allocation2] sm:$0xff]  ;;  %v43_v1 = vld [vmem:[#allocation2 + $0x8] sm:$0xff]  ;;  %vm146_vm1 = vcmask 261120  }
  0x13   :  { %v40_v2 = vld [vmem:[%s535_s0] sm:$0xff]  ;;  %v384_v3 = vpack.c.bf16 %v43_v1, %v42_v0  ;;  %v136_v5 = vld [vmem:[%s538_s3 + $0x8] sm:$0xff]  ;;  %v137_v8 = vld [vmem:[%s538_s3 + $0x10] sm:$0xff]  ;;  %vm322_vm2 = vcmask 64512  }
  0x14   :  { %359 = vmatprep.mubr.msk.f32.mxu0 %vm51_vm0, %v40_v2  ;;  %v135_v4 = vld [vmem:[%s538_s3] sm:$0xff]  ;;  %v41_v7 = vld [vmem:[%s535_s0 + $0x8] sm:$0xff]  ;;  %v138_v9 = vld [vmem:[%s538_s3 + $0x18] sm:$0xff] }
  0x15   :  { %v388_v6 = vpack.c.bf16 %v136_v5, %v135_v4  ;;  %385 = vmatprep.subr.bf16.mxu0 %v384_v3  ;;  %v392_v10 = vpack.c.bf16 %v138_v9, %v137_v8  ;;  %v230_v11 = vld [vmem:[%s540_s5] sm:$0xff]  ;;  %v231_v12 = vld [vmem:[%s540_s5 + $0x8] sm:$0xff]  ;;  %v232_v21 = vld [vmem:[%s540_s5 + $0x10] sm:$0xff] }
  0x16   :  { %387 = vmatpush3.bf16.msra.mxu0 %v384_v3  ;;  %v396_v13 = vpack.c.bf16 %v231_v12, %v230_v11  ;;  %v330_v14 = vld [vmem:[%s537_s2] ss:$0 sm:$0xff]  ;;  %v233_v22 = vld [vmem:[%s540_s5 + $0x18] sm:$0xff] }
  0x17   :  { %389 = vmatprep.subr.bf16.mxu1 %v388_v6  ;;  %v400_v23 = vpack.c.bf16 %v233_v22, %v232_v21  ;;  %v333_v24 = vld [vmem:[%s539_s4] ss:$0 sm:$0xff] }
  0x18   :  { %391 = vmatpush3.bf16.msra.mxu1 %v388_v6  ;;  %397 = vmatprep.subr.bf16.mxu0 %v396_v13  ;;  %v336_v31 = vld [vmem:[%s541_s6] ss:$0 sm:$0xff] }
  0x19   :  { %360 = vmatmul.mubr.msk.f32.vlgmr.msra.gmra.mrb[0].mxu0 %vm51_vm0, %v41_v7  ;;  %393 = vmatprep.subr.bf16.mxu1 %v392_v10 }
  0x1a   :  { %399 = vmatpush3.bf16.msra.mxu0 %v396_v13 }
  0x1b   :  { %401 = vmatprep.subr.bf16.mxu0 %v400_v23 }
  0x1c   :  { %395 = vmatpush3.bf16.msra.mxu1 %v392_v10 }
  0x1e   :  { %403 = vmatpush3.bf16.msra.mxu0 %v400_v23 }
  0xec   :  { %v361_v15 = vpop.f32.mrb[0].mxu0 }
  0xed   :  { %v130_v16 = vadd.f32 %v361_v15, %v330_v14  ;;  %v124_v17 = vpop.f32.mrb[1].mxu0 }
  0xee   :  { %v125_v18 = vadd.f32 %v330_v14, %v124_v17 }
  0xef   :  { %v134_v20 = vmax.f32 %v130_v16, 0.0 }
  0xf0   :  { %v133_v19 = vmax.f32 %v125_v18, 0.0 }
  0xf2   :  { %370 = vmatprep.mubr.msk.f32.mxu1 %vm146_vm1, %v133_v19 }
  0xf3   :  { %371 = vmatmul.mubr.msk.f32.vlgmr.msra.gmra.mrb[0].mxu1 %vm146_vm1, %v134_v20 }
 0x1c6   :  { %v372_v25 = vpop.f32.mrb[0].mxu1 }
 0x1c7   :  { %v225_v26 = vadd.f32 %v372_v25, %v333_v24  ;;  %v219_v27 = vpop.f32.mrb[1].mxu1 }
 0x1c8   :  { %v220_v28 = vadd.f32 %v333_v24, %v219_v27 }
 0x1c9   :  { %v229_v30 = vmax.f32 %v225_v26, 0.0 }
 0x1ca   :  { %v228_v29 = vmax.f32 %v220_v28, 0.0 }
 0x1cc   :  { %381 = vmatprep.mubr.msk.f32.mxu0 %vm146_vm1, %v228_v29 }
 0x1cd   :  { %382 = vmatmul.mubr.msk.f32.vlgmr.msra.gmra.mrb[2].mxu0 %vm146_vm1, %v229_v30 }
 0x2a0   :  { %v383_v32 = vpop.f32.mrb[2].mxu0 }
 0x2a1   :  { %v319_v33 = vadd.f32 %v383_v32, %v336_v31  ;;  %v313_v34 = vpop.f32.mrb[3].mxu0 }
 0x2a2   :  { %v314_v35 = vadd.f32 %v336_v31, %v313_v34 }
 0x2a3   :  { %324 = vst.msk [vmem:[%s542_s7 + $0x8] sm:$0xff] %vm322_vm2, %v319_v33 }
 0x2a4   :  { %323 = vst.msk [vmem:[%s542_s7] sm:$0xff] %vm322_vm2, %v314_v35 }
 0x2a5   :  { %329 = vsyncpa [#allocation3], 1 }

</bundles_post_ra>
